<compile_context>
chip_gen: v7x
topology: tpu7x:2x2x1
jax: 0.10.0
libtpu: 0.0.40
codegen_flags: <defaults>
</compile_context>

<pallas_src>
import functools

import jax
import jax.numpy as jnp
import numpy as np
from jax.experimental import pallas as pl
from jax.experimental.pallas import tpu as pltpu


LANE = 128  # TPU lane width; class / centroid axes are padded to this.


def _round_up(x, m):
    return (x + m - 1) // m * m


def _pad2(a, rows, cols):
    a = jnp.asarray(a)
    pr, pc = rows - a.shape[0], cols - a.shape[1]
    if pr or pc:
        a = jnp.pad(a, ((0, pr), (0, pc)))
    return a


def _pick_tk(d_in, tk_max):
    """Largest multiple of 128 <= tk_max that divides round_up(d_in, 128)."""
    dp = _round_up(d_in, 128)
    nblk = dp // 128
    tk = 128
    for div in range(1, nblk + 1):
        if nblk % div == 0 and 128 * div <= tk_max:
            tk = 128 * div
    return tk, dp


def duq_kernel(x_ref, w_ref, e_ref, s_ref, o_ref, acc_ref, *, tk, resident_w):
    k = pl.program_id(1)

    @pl.when(k == 0)
    def _():
        acc_ref[...] = jnp.zeros_like(acc_ref)

    if resident_w:
        off = pl.multiple_of(k * tk, tk)
        w = w_ref[pl.ds(off, tk), :]          # resident fused weight, sliced
    else:
        w = w_ref[...]                        # streamed fused-weight tile

    # Streaming fused matmul: (tb, tk) @ (tk, MNp) -> f32 accumulator.
    acc_ref[...] += jnp.dot(x_ref[...], w, preferred_element_type=jnp.float32)

    # RBF epilogue, once per batch tile (all operands f32, lane-dense).
    @pl.when(k == pl.num_programs(1) - 1)
    def _():
        diff = acc_ref[...] - e_ref[...]                                   # (tb, MNp)
        sm = jnp.dot(diff * diff, s_ref[...],
                     preferred_element_type=jnp.float32)                   # (tb, Np)
        o_ref[...] = jnp.exp(-sm)


def prepare_duq_params(wf, bf, W, m_buf, n_buf, sigma, *, tk_max=2048,
                       stream_dtype=jnp.bfloat16, resident_w_budget=8 << 20):
    """One-time parameter fusion / packing / padding. Call at model init.

    NOTE: sigma is baked into the selection matrix here; if sigma becomes a
    learned / traced value, pass it as an SMEM scalar operand instead.
    """
    D_in, J = wf.shape
    M, N, Jw = W.shape
    assert Jw == J
    MN = M * N

    tk, Dp = _pick_tk(D_in, tk_max)
    MNp = _round_up(MN, LANE)
    Np = _round_up(N, LANE)

    wt = jnp.transpose(W.reshape(MN, J)).astype(jnp.float32)     # (J, MN)
    # Offline fusion, done in f32 then cast to the streaming dtype ONCE.
    w_fused = wf.astype(jnp.float32) @ wt                        # (D_in, MN)
    b_fused = bf.astype(jnp.float32) @ wt                        # (MN,)
    emb = (m_buf / n_buf[None, :]).reshape(MN).astype(jnp.float32)
    emb_eff = emb - b_fused                                      # (MN,)

    inv_denom = 1.0 / (M * 2.0 * float(sigma) ** 2)
    sel = jnp.tile(jnp.eye(N, dtype=jnp.float32), (M, 1)) * inv_denom  # (MN, N)

    w_p = _pad2(w_fused, Dp, MNp).astype(stream_dtype)           # streamed/resident
    e_p = _pad2(emb_eff.reshape(1, MN), 1, MNp).astype(jnp.float32)
    s_p = _pad2(sel, MNp, Np).astype(jnp.float32)

    sbytes = jnp.dtype(stream_dtype).itemsize
    resident_w = 2 * Dp * MNp * sbytes <= resident_w_budget      # 2x: double-buffer

    return dict(w=w_p, emb=e_p, sel=s_p,
                dims=(D_in, J, M, N), pads=(Dp, MNp, Np),
                tk=tk, stream_dtype=stream_dtype, resident_w=resident_w)


def resnet_duq_forward(x, params, *, tb_max=128):
    """x: (B, C, H, W) NCHW. Returns (B, num_classes) float32."""
    D_in, J, M, N = params["dims"]
    Dp, MNp, Np = params["pads"]
    tk = params["tk"]
    stream_dtype = params["stream_dtype"]
    resident_w = params["resident_w"]
    sbytes = jnp.dtype(stream_dtype).itemsize

    B = x.shape[0]
    sub = 16 if sbytes == 2 else 8
    tb = min(tb_max, _round_up(B, sub))
    Bp = _round_up(B, tb)
    if Bp // tb < 2 and tb >= 2 * sub:
        # v7x megacore: give the 'parallel' batch axis >= 2 tiles when possible.
        tb = max(sub, _round_up(tb // 2, sub))
        Bp = _round_up(B, tb)

    x_flat = x.reshape(B, -1)
    assert x_flat.shape[1] == D_in
    x_p = _pad2(x_flat, Bp, Dp).astype(stream_dtype)             # minimal pad

    nb, nk = Bp // tb, Dp // tk
    kernel = functools.partial(duq_kernel, tk=tk, resident_w=resident_w)

    if resident_w:
        w_spec = pl.BlockSpec((Dp, MNp), lambda i, k: (0, 0))    # DMA'd once
    else:
        w_spec = pl.BlockSpec((tk, MNp), lambda i, k: (k, 0))    # streamed

    # VMEM budget computed from actual tile sizes (v7x: 64 MiB physical).
    w_vmem = 2 * (Dp if resident_w else tk) * MNp * sbytes
    vmem_use = (2 * tb * tk * sbytes + w_vmem
                + 2 * MNp * 4 + 2 * MNp * Np * 4
                + tb * MNp * 4 + 2 * tb * Np * 4)
    vmem_limit = int(min(max(2 * vmem_use + (2 << 20), 16 << 20), 48 << 20))

    cost = pl.CostEstimate(
        flops=2 * Bp * Dp * MNp + 2 * Bp * MNp * Np + 3 * Bp * MNp,
        transcendentals=Bp * Np,
        bytes_accessed=Bp * Dp * sbytes
        + Dp * MNp * sbytes * (1 if resident_w else nb)
        + (MNp + MNp * Np) * 4 + Bp * Np * 4,
    )

    out = pl.pallas_call(
        kernel,
        out_shape=jax.ShapeDtypeStruct((Bp, Np), jnp.float32),
        grid=(nb, nk),
        in_specs=[
            pl.BlockSpec((tb, tk), lambda i, k: (i, k)),     # x: streamed
            w_spec,                                          # fused weight
            pl.BlockSpec((1, MNp), lambda i, k: (0, 0)),     # embeddings: resident
            pl.BlockSpec((MNp, Np), lambda i, k: (0, 0)),    # scaled selection: resident
        ],
        out_specs=pl.BlockSpec((tb, Np), lambda i, k: (i, 0)),
        scratch_shapes=[pltpu.VMEM((tb, MNp), jnp.float32)],  # z_proj accumulator
        compiler_params=pltpu.CompilerParams(
            dimension_semantics=("parallel", "arbitrary"),
            vmem_limit_bytes=vmem_limit),
        cost_estimate=cost,
    )(x_p, params["w"], params["emb"], params["sel"])

    return out[:B, :N]


def reference_forward(x, wf, bf, W, m_buf, n_buf, sigma):
    """Pure-JAX reference mirroring the PyTorch module exactly (f32)."""
    z = x.reshape(x.shape[0], -1) @ wf + bf                  # feature_extractor
    zp = jnp.einsum('ij,mnj->imn', z, W)
    emb = m_buf / n_buf[None, :]
    diff = zp - emb[None]
    return jnp.exp(-(diff ** 2).mean(1) / (2.0 * sigma ** 2))


if __name__ == "__main__":
    key = jax.random.PRNGKey(0)
    k_x, k_wf, k_W, k_m = jax.random.split(key, 4)

    # Small shapes consistent with the module's forward.
    B, C, H, Wd = 2, 4, 16, 16          # NCHW input
    D_in = C * H * Wd                   # flattened feature-extractor input
    model_output_size = 32              # J
    centroid_size = 16                  # M
    num_classes = 8                     # N
    length_scale = 0.1                  # sigma
    gamma = 0.999                       # unused in forward

    # Deterministic parameter init (shapes per __init__; synthetic values).
    x = jax.random.normal(k_x, (B, C, H, Wd), dtype=jnp.float32)
    wf = jax.random.normal(k_wf, (D_in, model_output_size), jnp.float32) * np.sqrt(2.0 / D_in)
    bf = jnp.zeros((model_output_size,), jnp.float32)
    # W ~ kaiming_normal_(nonlinearity='relu'): std = sqrt(2 / fan_in), fan_in = N*J
    W = jax.random.normal(
        k_W, (centroid_size, num_classes, model_output_size), jnp.float32
    ) * np.sqrt(2.0 / (num_classes * model_output_size))
    # buffers: N = 13, m = normal(0, 0.05) * N
    n_buf = jnp.zeros((num_classes,), jnp.float32) + 13.0
    m_buf = jax.random.normal(k_m, (centroid_size, num_classes), jnp.float32) * 0.05
    m_buf = m_buf * n_buf

    y_ref = reference_forward(x, wf, bf, W, m_buf, n_buf, length_scale)

    # ---- exact-precision path (f32 streaming): tight check vs reference ----
    params_f32 = prepare_duq_params(wf, bf, W, m_buf, n_buf, length_scale,
                                    stream_dtype=jnp.float32)
    y32 = jax.block_until_ready(resnet_duq_forward(x, params_f32))
    np.testing.assert_allclose(np.asarray(y32), np.asarray(y_ref),
                               rtol=5e-3, atol=1e-12)

    # ---- bf16 weight-streaming path (production config) ----
    # sigma=0.1 makes the RBF exponent ~O(25), so compare in log space where
    # bf16 streaming error appears additively instead of exponentially.
    params_bf16 = prepare_duq_params(wf, bf, W, m_buf, n_buf, length_scale,
                                     stream_dtype=jnp.bfloat16)
    ybf = jax.block_until_ready(resnet_duq_forward(x, params_bf16))
    d_kernel = -np.log(np.maximum(np.asarray(ybf, np.float64), 1e-300))
    d_ref = -np.log(np.maximum(np.asarray(y_ref, np.float64), 1e-300))
    np.testing.assert_allclose(d_kernel, d_ref, rtol=5e-2, atol=0.5)

    print("KERNEL_OK")
</pallas_src>

<mosaic_0001>
module attributes {stable_mosaic.version = 11 : i64} {
  func.func @duq_kernel(%arg0: i32, %arg1: i32, %arg2: memref<8x1024xf32, #tpu.memory_space<vmem>>, %arg3: memref<1024x128xf32, #tpu.memory_space<vmem>>, %arg4: memref<1x128xf32, #tpu.memory_space<vmem>>, %arg5: memref<128x128xf32, #tpu.memory_space<vmem>>, %arg6: memref<8x128xf32, #tpu.memory_space<vmem>>, %arg7: memref<8x128xf32, #tpu.memory_space<vmem>>) attributes {dimension_semantics = [#tpu.dimension_semantics<parallel>, #tpu.dimension_semantics<arbitrary>], iteration_bounds = array<i64: 1, 1>, scalar_prefetch = 0 : i64, scratch_operands = 1 : i64, tpu.core_type = #tpu.core_type<tc>, window_params = [{transform_indices = @transform_0, window_bounds = array<i64: 8, 1024>}, {pipeline_mode = #tpu.pipeline_mode<synchronous>, transform_indices = @transform_1, window_bounds = array<i64: 1024, 128>}, {pipeline_mode = #tpu.pipeline_mode<synchronous>, transform_indices = @transform_2, window_bounds = array<i64: 1, 128>}, {pipeline_mode = #tpu.pipeline_mode<synchronous>, transform_indices = @transform_3, window_bounds = array<i64: 128, 128>}, {transform_indices = @transform_4, window_bounds = array<i64: 8, 128>}]} {
    %c0_i32 = arith.constant 0 : i32
    %0 = arith.cmpi eq, %arg1, %c0_i32 : i32
    %1 = arith.extui %0 : i1 to i32
    %c0_i32_0 = arith.constant 0 : i32
    %2 = arith.cmpi ne, %1, %c0_i32_0 : i32
    scf.if %2 {
      %cst_9 = arith.constant 0.000000e+00 : f32
      %15 = vector.broadcast %cst_9 : f32 to vector<8x128xf32>
      %c0_10 = arith.constant 0 : index
      %c0_11 = arith.constant 0 : index
      %16 = vector.load %arg7[%c0_10, %c0_11] : memref<8x128xf32, #tpu.memory_space<vmem>>, vector<8x128xf32>
      tpu.vector_store %arg7[%c0_10, %c0_11], %15 {strides = array<i32>} : memref<8x128xf32, #tpu.memory_space<vmem>>, vector<8x128xf32>,
    } else {
    }
    %c1024_i32 = arith.constant 1024 : i32
    %3 = arith.muli %arg1, %c1024_i32 : i32
    %4 = tpu.assume_multiple %3, 1024 : i32
    %5 = arith.index_cast %4 : i32 to index
    %c0 = arith.constant 0 : index
    %6 = vector.load %arg3[%5, %c0] : memref<1024x128xf32, #tpu.memory_space<vmem>>, vector<1024x128xf32>
    %c0_1 = arith.constant 0 : index
    %c0_2 = arith.constant 0 : index
    %7 = vector.load %arg7[%c0_1, %c0_2] : memref<8x128xf32, #tpu.memory_space<vmem>>, vector<8x128xf32>
    %c0_3 = arith.constant 0 : index
    %c0_4 = arith.constant 0 : index
    %8 = vector.load %arg2[%c0_3, %c0_4] : memref<8x1024xf32, #tpu.memory_space<vmem>>, vector<8x1024xf32>
    %cst = arith.constant dense<0.000000e+00> : vector<8x128xf32>
    %9 = tpu.matmul %8, %6, %cst {dimension_numbers = #tpu.dot_dimension_numbers<[1], [0], [0], [1], [0, 0, 1, 1], [], []>} : vector<8x1024xf32>, vector<1024x128xf32>, vector<8x128xf32> -> vector<8x128xf32>
    %10 = arith.addf %7, %9 : vector<8x128xf32>
    %c0_5 = arith.constant 0 : index
    %c0_6 = arith.constant 0 : index
    %11 = vector.load %arg7[%c0_5, %c0_6] : memref<8x128xf32, #tpu.memory_space<vmem>>, vector<8x128xf32>
    tpu.vector_store %arg7[%c0_5, %c0_6], %10 {strides = array<i32>} : memref<8x128xf32, #tpu.memory_space<vmem>>, vector<8x128xf32>,
    %c0_i32_7 = arith.constant 0 : i32
    %12 = arith.cmpi eq, %arg1, %c0_i32_7 : i32
    %13 = arith.extui %12 : i1 to i32
    %c0_i32_8 = arith.constant 0 : i32
    %14 = arith.cmpi ne, %13, %c0_i32_8 : i32
    scf.if %14 {
      %c0_9 = arith.constant 0 : index
      %c0_10 = arith.constant 0 : index
      %15 = vector.load %arg7[%c0_9, %c0_10] : memref<8x128xf32, #tpu.memory_space<vmem>>, vector<8x128xf32>
      %c0_11 = arith.constant 0 : index
      %c0_12 = arith.constant 0 : index
      %16 = vector.load %arg4[%c0_11, %c0_12] : memref<1x128xf32, #tpu.memory_space<vmem>>, vector<1x128xf32>
      %17 = vector.broadcast %16 : vector<1x128xf32> to vector<8x128xf32>
      %18 = arith.subf %15, %17 : vector<8x128xf32>
      %19 = arith.mulf %18, %18 : vector<8x128xf32>
      %c0_13 = arith.constant 0 : index
      %c0_14 = arith.constant 0 : index
      %20 = vector.load %arg5[%c0_13, %c0_14] : memref<128x128xf32, #tpu.memory_space<vmem>>, vector<128x128xf32>
      %cst_15 = arith.constant dense<0.000000e+00> : vector<8x128xf32>
      %21 = tpu.matmul %19, %20, %cst_15 {dimension_numbers = #tpu.dot_dimension_numbers<[1], [0], [0], [1], [0, 0, 1, 1], [], []>} : vector<8x128xf32>, vector<128x128xf32>, vector<8x128xf32> -> vector<8x128xf32>
      %cst_16 = arith.constant 0.000000e+00 : f32
      %22 = vector.broadcast %cst_16 : f32 to vector<8x128xf32>
      %23 = arith.subf %22, %21 : vector<8x128xf32>
      %24 = math.exp %23 : vector<8x128xf32>
      %c0_17 = arith.constant 0 : index
      %c0_18 = arith.constant 0 : index
      %25 = vector.load %arg6[%c0_17, %c0_18] : memref<8x128xf32, #tpu.memory_space<vmem>>, vector<8x128xf32>
      tpu.vector_store %arg6[%c0_17, %c0_18], %24 {strides = array<i32>} : memref<8x128xf32, #tpu.memory_space<vmem>>, vector<8x128xf32>,
    } else {
    }
    return
  }
  func.func @transform_0(%arg0: i32, %arg1: i32) -> (i32, i32) {
    %c0_i32 = arith.constant 0 : i32
    return %arg0, %arg1 : i32, i32
  }
  func.func @transform_1(%arg0: i32, %arg1: i32) -> (i32, i32) {
    %c0_i32 = arith.constant 0 : i32
    %c0_i32_0 = arith.constant 0 : i32
    %c0_i32_1 = arith.constant 0 : i32
    return %c0_i32, %c0_i32_0 : i32, i32
  }
  func.func @transform_2(%arg0: i32, %arg1: i32) -> (i32, i32) {
    %c0_i32 = arith.constant 0 : i32
    %c0_i32_0 = arith.constant 0 : i32
    %c0_i32_1 = arith.constant 0 : i32
    return %c0_i32, %c0_i32_0 : i32, i32
  }
  func.func @transform_3(%arg0: i32, %arg1: i32) -> (i32, i32) {
    %c0_i32 = arith.constant 0 : i32
    %c0_i32_0 = arith.constant 0 : i32
    %c0_i32_1 = arith.constant 0 : i32
    return %c0_i32, %c0_i32_0 : i32, i32
  }
  func.func @transform_4(%arg0: i32, %arg1: i32) -> (i32, i32) {
    %c0_i32 = arith.constant 0 : i32
    %c0_i32_0 = arith.constant 0 : i32
    return %arg0, %c0_i32 : i32, i32
  }
}

</mosaic_0001>

<bundles_post_ra>
// kernel: tpu_custom_call.1
= control target key start
LH: loop header
LB: loop body
LE: loop exit
PB: predicated region body
PF: predicated region fallthrough
CT: control target
= control target key end

     0   :  { %9 = vsyncpa [#allocation4], 0  ;;  %s1143_s0 = inlined_call_operand.hbm [shape: f32[8,1024], index: 0, kind: input, shape index: {}]   ;;  %s1144_s1 = inlined_call_operand.hbm [shape: f32[1024,128], index: 1, kind: input, shape index: {}]   ;;  %s1145_s2 = inlined_call_operand.vmem [shape: f32[1,128], index: 2, kind: input, shape index: {}]   ;;  %s1146_s3 = inlined_call_operand.hbm [shape: f32[128,128], index: 3, kind: input, shape index: {}]   ;;  %s1147_s4 = inlined_call_operand.hbm [shape: f32[8,128], index: 4, kind: output, shape index: {}]  }
   0x1   :  { %10 = vsyncpa [#allocation7], 0 }
   0x2   :  { %11 = vsyncpa [#allocation5], 0  ;;  %s1052_s15 = smov [#allocation6]   ;;  %s958_s19 = scalar_lea.hbm %s1144_s1, 16384 }
   0x3   :  { %s27_s16 = sshll.u32 %s1052_s15, 4  ;;  %p959_p0 = scmp.ne.s32.totalorder %s1144_s1, %s958_s19  ;;  %s28_s16 = int_to_ptr.vmem [resolvable:$true] %s27_s16 }
   0x4   :  { %p962_p1 = scmp.lt.u32.totalorder %s958_s19, %s1144_s1 }
   0x6   :  { %p964_p2 = pnand %p962_p1, %p959_p0 }
   0x8   :  { %967 = shalt.err (!%p964_p2)
}
   0x9   :  { %s968_s24 = scalar_lea.vmem %s28_s16, 16384  ;;  %p973_p4 = scmp.lt.s32.totalorder %s28_s16, %s28_s16 }
   0xa   :  { %p969_p3 = scmp.ne.s32.totalorder %s28_s16, %s968_s24  ;;  %p974_p5 = scmp.lt.s32.totalorder %s968_s24, %s968_s24 }
   0xc   :  { %p975_p6 = por %p974_p5, %p973_p4 }
   0xe   :  { %p976_p7 = pnand %p975_p6, %p969_p3 }
  0x10   :  { %979 = shalt.err (!%p976_p7)
}
  0x11   :  { %s1053_s25 = smov 128   ;;  %s1054_s26 = smov 8  }
  0x12   :  { %33 = dma.hbm_to_vmem [thread:$0]  %s1144_s1, 16384, %s28_s16, [#allocation7], %s1053_s25, %s1053_s25, %s1054_s26  }
  0x13   :  { %s1055_s29 = smov [#allocation3]   ;;  %s1056_s5 = smov [#allocation8]  }
  0x14   :  { %s18_s30 = sshll.u32 %s1055_s29, 4  ;;  %s41_s6 = sshll.u32 %s1056_s5, 4  ;;  %s19_s30 = int_to_ptr.vmem [resolvable:$true] %s18_s30  ;;  %s42_s6 = int_to_ptr.vmem [resolvable:$true] %s41_s6 }
  0x15   :  { %s980_s9 = scalar_lea.hbm %s1143_s0, 1024 }
  0x16   :  { %p981_p8 = scmp.ne.s32.totalorder %s1143_s0, %s980_s9  ;;  %p984_p9 = scmp.lt.u32.totalorder %s980_s9, %s1143_s0 }
  0x18   :  { %p986_p10 = pnand %p984_p9, %p981_p8 }
  0x1a   :  { %989 = shalt.err (!%p986_p10)
}
  0x1b   :  { %s990_s1 = scalar_lea.vmem %s19_s30, 1024  ;;  %p995_p12 = scmp.lt.s32.totalorder %s19_s30, %s19_s30 }
  0x1c   :  { %p991_p11 = scmp.ne.s32.totalorder %s19_s30, %s990_s1  ;;  %p996_p13 = scmp.lt.s32.totalorder %s990_s1, %s990_s1 }
  0x1e   :  { %p997_p0 = por %p996_p13, %p995_p12 }
  0x20   :  { %p998_p1 = pnand %p997_p0, %p991_p11 }
  0x22   :  { %1001 = shalt.err (!%p998_p1)
}
  0x23   :  { %21 = dma.hbm_to_vmem [thread:$0]  %s1143_s0, 1024, %s19_s30, [#allocation4]  }
  0x24   :  { %s1002_s18 = scalar_lea.hbm %s1146_s3, 2048 }
  0x25   :  { %p1003_p2 = scmp.ne.s32.totalorder %s1146_s3, %s1002_s18  ;;  %p1006_p3 = scmp.lt.u32.totalorder %s1002_s18, %s1146_s3 }
  0x27   :  { %p1008_p4 = pnand %p1006_p3, %p1003_p2 }
  0x29   :  { %1011 = shalt.err (!%p1008_p4)
}
  0x2a   :  { %s1012_s23 = scalar_lea.vmem %s42_s6, 2048  ;;  %p1017_p6 = scmp.lt.s32.totalorder %s42_s6, %s42_s6 }
  0x2b   :  { %p1013_p5 = scmp.ne.s32.totalorder %s42_s6, %s1012_s23  ;;  %p1018_p7 = scmp.lt.s32.totalorder %s1012_s23, %s1012_s23 }
  0x2d   :  { %p1019_p8 = por %p1018_p7, %p1017_p6 }
  0x2f   :  { %p1020_p9 = pnand %p1019_p8, %p1013_p5 }
  0x31   :  { %1023 = shalt.err (!%p1020_p9)
}
  0x32   :  { %47 = dma.hbm_to_vmem [thread:$0]  %s1146_s3, 2048, %s42_s6, [#allocation7], %s1053_s25, %s1053_s25, %s1054_s26  }
  0x33   :  { %1046 = dma.done.wait [#allocation4], 1024  }
  0x34   :  { %1047 = vsyncadd [#allocation4], 4294966272 }
  0x35   :  { %1048 = dma.done.wait [#allocation7], 18432  }
  0x36   :  { %1049 = vsyncadd [#allocation7], 4294948864  ;;  %v80_v0 = vld [vmem:[#allocation6 + $0x80] sm:$0xff]  ;;  %v81_v1 = vld [vmem:[#allocation6 + $0x88] sm:$0xff]  ;;  %vm1058_vm0 = vmmov 0   ;;  %s1060_s26 = smov [#allocation9]  }
  0x37   :  { %v112_v2 = vld [vmem:[#allocation6 + $0x180] sm:$0xff]  ;;  %v795_v3 = vpack.c.bf16 %v81_v1, %v80_v0  ;;  %v113_v4 = vld [vmem:[#allocation6 + $0x188] sm:$0xff]  ;;  %v82_v11 = vld [vmem:[#allocation6 + $0x90] sm:$0xff]  ;;  %s592_s27 = sshll.u32 %s1060_s26, 4  ;;  %s593_s27 = int_to_ptr.vmem [resolvable:$true] %s592_s27 }
  0x38   :  { %v64_v5 = vld [vmem:[#allocation6] sm:$0xff]  ;;  %v65_v6 = vld [vmem:[#allocation6 + $0x8] sm:$0xff]  ;;  %v827_v7 = vpack.c.bf16 %v113_v4, %v112_v2  ;;  %v83_v13 = vld [vmem:[#allocation6 + $0x98] sm:$0xff]  ;;  %s1024_s28 = scalar_lea.vmem %s593_s27, 128  ;;  %p1029_p11 = scmp.lt.s32.totalorder %s593_s27, %s593_s27 }
  0x39   :  { %v797_v8 = vpack.c.bf16 %v65_v6, %v64_v5  ;;  %v96_v9 = vld [vmem:[#allocation6 + $0x100] sm:$0xff]  ;;  %v97_v10 = vld [vmem:[#allocation6 + $0x108] sm:$0xff]  ;;  %796 = vmatprep.subr.bf16.mxu0 %v795_v3  ;;  %v114_v14 = vld [vmem:[#allocation6 + $0x190] sm:$0xff]  ;;  %v799_v16 = vpack.c.bf16 %v83_v13, %v82_v11  ;;  %p1025_p10 = scmp.ne.s32.totalorder %s593_s27, %s1024_s28  ;;  %p1030_p12 = scmp.lt.s32.totalorder %s1024_s28, %s1024_s28 }
  0x3a   :  { %v829_v12 = vpack.c.bf16 %v97_v10, %v96_v9  ;;  %v115_v15 = vld [vmem:[#allocation6 + $0x198] sm:$0xff]  ;;  %828 = vmatprep.subr.bf16.mxu1 %v827_v7  ;;  %v66_v18 = vld [vmem:[#allocation6 + $0x10] sm:$0xff]  ;;  %v84_v23 = vld [vmem:[#allocation6 + $0xa0] sm:$0xff] }
  0x3b   :  { %798 = vmatpush3.bf16.msra.mxu0 %v797_v8  ;;  %v831_v17 = vpack.c.bf16 %v115_v15, %v114_v14  ;;  %v67_v19 = vld [vmem:[#allocation6 + $0x18] sm:$0xff]  ;;  %v98_v20 = vld [vmem:[#allocation6 + $0x110] sm:$0xff]  ;;  %v85_v24 = vld [vmem:[#allocation6 + $0xa8] sm:$0xff]  ;;  %p1031_p13 = por %p1030_p12, %p1029_p11 }
  0x3c   :  { %830 = vmatpush3.bf16.msra.mxu1 %v829_v12  ;;  %v801_v21 = vpack.c.bf16 %v67_v19, %v66_v18  ;;  %v99_v22 = vld [vmem:[#allocation6 + $0x118] sm:$0xff]  ;;  %800 = vmatprep.subr.bf16.mxu0 %v799_v16  ;;  %v803_v26 = vpack.c.bf16 %v85_v24, %v84_v23  ;;  %v116_v27 = vld [vmem:[#allocation6 + $0x1a0] sm:$0xff]  ;;  %v117_v28 = vld [vmem:[#allocation6 + $0x1a8] sm:$0xff] }
  0x3d   :  { %832 = vmatprep.subr.bf16.mxu1 %v831_v17  ;;  %v833_v25 = vpack.c.bf16 %v99_v22, %v98_v20  ;;  %v68_v29 = vld [vmem:[#allocation6 + $0x20] sm:$0xff]  ;;  %v835_v30 = vpack.c.bf16 %v117_v28, %v116_v27  ;;  %v69_v31 = vld [vmem:[#allocation6 + $0x28] sm:$0xff]  ;;  %v86_v35 = vld [vmem:[#allocation6 + $0xb0] sm:$0xff]  ;;  %p1032_p0 = pnand %p1031_p13, %p1025_p10 }
  0x3e   :  { %v100_v32 = vld [vmem:[#allocation6 + $0x120] sm:$0xff]  ;;  %v101_v33 = vld [vmem:[#allocation6 + $0x128] sm:$0xff]  ;;  %v805_v34 = vpack.c.bf16 %v69_v31, %v68_v29  ;;  %v87_v36 = vld [vmem:[#allocation6 + $0xb8] sm:$0xff] }
  0x3f   :  { %802 = vmatpush3.bf16.msra.mxu0 %v801_v21  ;;  %v118_v37 = vld [vmem:[#allocation6 + $0x1b0] sm:$0xff]  ;;  %v837_v38 = vpack.c.bf16 %v101_v33, %v100_v32  ;;  %v807_v39 = vpack.c.bf16 %v87_v36, %v86_v35  ;;  %v119_v40 = vld [vmem:[#allocation6 + $0x1b8] sm:$0xff]  ;;  %v88_v46 = vld [vmem:[#allocation6 + $0xc0] sm:$0xff] }
  0x40   :  { %834 = vmatpush3.bf16.msra.mxu1 %v833_v25  ;;  %804 = vmatprep.subr.bf16.mxu0 %v803_v26  ;;  %v70_v41 = vld [vmem:[#allocation6 + $0x30] sm:$0xff]  ;;  %v71_v42 = vld [vmem:[#allocation6 + $0x38] sm:$0xff]  ;;  %v839_v43 = vpack.c.bf16 %v119_v40, %v118_v37  ;;  %v89_v47 = vld [vmem:[#allocation6 + $0xc8] sm:$0xff] }
  0x41   :  { %836 = vmatprep.subr.bf16.mxu1 %v835_v30  ;;  %v102_v44 = vld [vmem:[#allocation6 + $0x130] sm:$0xff]  ;;  %v103_v45 = vld [vmem:[#allocation6 + $0x138] sm:$0xff]  ;;  %v120_v48 = vld [vmem:[#allocation6 + $0x1c0] sm:$0xff]  ;;  %v809_v50 = vpack.c.bf16 %v71_v42, %v70_v41  ;;  %v811_v52 = vpack.c.bf16 %v89_v47, %v88_v46 }
  0x42   :  { %v121_v49 = vld [vmem:[#allocation6 + $0x1c8] sm:$0xff]  ;;  %v841_v51 = vpack.c.bf16 %v103_v45, %v102_v44  ;;  %v72_v53 = vld [vmem:[#allocation6 + $0x40] sm:$0xff]  ;;  %v90_v58 = vld [vmem:[#allocation6 + $0xd0] sm:$0xff] }
  0x43   :  { %806 = vmatpush3.bf16.msra.mxu0 %v805_v34  ;;  %v73_v54 = vld [vmem:[#allocation6 + $0x48] sm:$0xff]  ;;  %v104_v55 = vld [vmem:[#allocation6 + $0x140] sm:$0xff]  ;;  %v843_v56 = vpack.c.bf16 %v121_v49, %v120_v48  ;;  %v91_v59 = vld [vmem:[#allocation6 + $0xd8] sm:$0xff] }
  0x44   :  { %838 = vmatpush3.bf16.msra.mxu1 %v837_v38  ;;  %808 = vmatprep.subr.bf16.mxu0 %v807_v39  ;;  %v105_v57 = vld [vmem:[#allocation6 + $0x148] sm:$0xff]  ;;  %v122_v60 = vld [vmem:[#allocation6 + $0x1d0] sm:$0xff]  ;;  %v123_v61 = vld [vmem:[#allocation6 + $0x1d8] sm:$0xff]  ;;  %v813_v62 = vpack.c.bf16 %v73_v54, %v72_v53  ;;  %v815_v0 = vpack.c.bf16 %v91_v59, %v90_v58 }
  0x45   :  { %840 = vmatprep.subr.bf16.mxu1 %v839_v43  ;;  %v845_v63 = vpack.c.bf16 %v105_v57, %v104_v55  ;;  %v74_v1 = vld [vmem:[#allocation6 + $0x50] sm:$0xff]  ;;  %v75_v2 = vld [vmem:[#allocation6 + $0x58] sm:$0xff]  ;;  %v847_v4 = vpack.c.bf16 %v123_v61, %v122_v60  ;;  %v92_v6 = vld [vmem:[#allocation6 + $0xe0] sm:$0xff] }
  0x46   :  { %v106_v3 = vld [vmem:[#allocation6 + $0x150] sm:$0xff]  ;;  %v107_v5 = vld [vmem:[#allocation6 + $0x158] sm:$0xff]  ;;  %v93_v7 = vld [vmem:[#allocation6 + $0xe8] sm:$0xff]  ;;  %v817_v10 = vpack.c.bf16 %v75_v2, %v74_v1 }
  0x47   :  { %810 = vmatpush3.bf16.msra.mxu0 %v809_v50  ;;  %v124_v8 = vld [vmem:[#allocation6 + $0x1e0] sm:$0xff]  ;;  %v125_v9 = vld [vmem:[#allocation6 + $0x1e8] sm:$0xff]  ;;  %v849_v13 = vpack.c.bf16 %v107_v5, %v106_v3  ;;  %v819_v14 = vpack.c.bf16 %v93_v7, %v92_v6  ;;  %v196_v17 = vld [vmem:[#allocation3 + $0x18] sm:$0xff] }
  0x48   :  { %842 = vmatpush3.bf16.msra.mxu1 %v841_v51  ;;  %812 = vmatprep.subr.bf16.mxu0 %v811_v52  ;;  %v76_v11 = vld [vmem:[#allocation6 + $0x60] sm:$0xff]  ;;  %v77_v12 = vld [vmem:[#allocation6 + $0x68] sm:$0xff]  ;;  %v851_v18 = vpack.c.bf16 %v125_v9, %v124_v8  ;;  %v94_v20 = vld [vmem:[#allocation6 + $0xf0] sm:$0xff] }
  0x49   :  { %844 = vmatprep.subr.bf16.mxu1 %v843_v56  ;;  %v108_v15 = vld [vmem:[#allocation6 + $0x160] sm:$0xff]  ;;  %v194_v16 = vld [vmem:[#allocation3 + $0x8] sm:$0xff]  ;;  %v95_v21 = vld [vmem:[#allocation6 + $0xf8] sm:$0xff]  ;;  %335 = vmatprep.mubr.f32.mxu1 %v196_v17  ;;  %v821_v24 = vpack.c.bf16 %v77_v12, %v76_v11 }
  0x4a   :  { %v109_v19 = vld [vmem:[#allocation6 + $0x168] sm:$0xff]  ;;  %265 = vmatprep.mubr.f32.mxu0 %v194_v16  ;;  %v126_v22 = vld [vmem:[#allocation6 + $0x1f0] sm:$0xff]  ;;  %v127_v23 = vld [vmem:[#allocation6 + $0x1f8] sm:$0xff]  ;;  %v823_v26 = vpack.c.bf16 %v95_v21, %v94_v20 }
  0x4b   :  { %814 = vmatpush3.bf16.msra.mxu0 %v813_v62  ;;  %v853_v25 = vpack.c.bf16 %v109_v19, %v108_v15  ;;  %v78_v27 = vld [vmem:[#allocation6 + $0x70] sm:$0xff]  ;;  %v79_v28 = vld [vmem:[#allocation6 + $0x78] sm:$0xff]  ;;  %v855_v30 = vpack.c.bf16 %v127_v23, %v126_v22  ;;  %v144_v32 = vld [vmem:[#allocation6 + $0x280] sm:$0xff] }
  0x4c   :  { %846 = vmatpush3.bf16.msra.mxu1 %v845_v63  ;;  %816 = vmatprep.subr.bf16.mxu0 %v815_v0  ;;  %v110_v29 = vld [vmem:[#allocation6 + $0x170] sm:$0xff]  ;;  %v111_v31 = vld [vmem:[#allocation6 + $0x178] sm:$0xff]  ;;  %v145_v33 = vld [vmem:[#allocation6 + $0x288] sm:$0xff]  ;;  %v825_v36 = vpack.c.bf16 %v79_v28, %v78_v27 }
  0x4d   :  { %848 = vmatprep.subr.bf16.mxu1 %v847_v4  ;;  %v176_v34 = vld [vmem:[#allocation6 + $0x380] sm:$0xff]  ;;  %v177_v35 = vld [vmem:[#allocation6 + $0x388] sm:$0xff]  ;;  %v857_v37 = vpack.c.bf16 %v111_v31, %v110_v29  ;;  %v859_v38 = vpack.c.bf16 %v145_v33, %v144_v32  ;;  %v146_v44 = vld [vmem:[#allocation6 + $0x290] sm:$0xff] }
  0x4e   :  { %v128_v39 = vld [vmem:[#allocation6 + $0x200] sm:$0xff]  ;;  %v129_v40 = vld [vmem:[#allocation6 + $0x208] sm:$0xff]  ;;  %v891_v42 = vpack.c.bf16 %v177_v35, %v176_v34  ;;  %v147_v45 = vld [vmem:[#allocation6 + $0x298] sm:$0xff] }
  0x4f   :  { %818 = vmatpush3.bf16.msra.mxu0 %v817_v10  ;;  %v160_v41 = vld [vmem:[#allocation6 + $0x300] sm:$0xff]  ;;  %v161_v43 = vld [vmem:[#allocation6 + $0x308] sm:$0xff]  ;;  %v178_v46 = vld [vmem:[#allocation6 + $0x390] sm:$0xff]  ;;  %v861_v50 = vpack.c.bf16 %v129_v40, %v128_v39  ;;  %v863_v52 = vpack.c.bf16 %v147_v45, %v146_v44 }
  0x50   :  { %850 = vmatpush3.bf16.msra.mxu1 %v849_v13  ;;  %820 = vmatprep.subr.bf16.mxu0 %v819_v14  ;;  %v179_v47 = vld [vmem:[#allocation6 + $0x398] sm:$0xff]  ;;  %v193_v48 = vld [vmem:[#allocation3] sm:$0xff]  ;;  %v195_v49 = vld [vmem:[#allocation3 + $0x10] sm:$0xff]  ;;  %v893_v51 = vpack.c.bf16 %v161_v43, %v160_v41 }
  0x51   :  { %852 = vmatprep.subr.bf16.mxu1 %v851_v18  ;;  %v130_v53 = vld [vmem:[#allocation6 + $0x210] sm:$0xff]  ;;  %v131_v54 = vld [vmem:[#allocation6 + $0x218] sm:$0xff]  ;;  %v895_v56 = vpack.c.bf16 %v179_v47, %v178_v46  ;;  %v148_v58 = vld [vmem:[#allocation6 + $0x2a0] sm:$0xff] }
  0x52   :  { %v162_v55 = vld [vmem:[#allocation6 + $0x310] sm:$0xff]  ;;  %v163_v57 = vld [vmem:[#allocation6 + $0x318] sm:$0xff]  ;;  %v149_v59 = vld [vmem:[#allocation6 + $0x2a8] sm:$0xff]  ;;  %v865_v62 = vpack.c.bf16 %v131_v54, %v130_v53 }
  0x53   :  { %822 = vmatpush3.bf16.msra.mxu0 %v821_v24  ;;  %v180_v60 = vld [vmem:[#allocation6 + $0x3a0] sm:$0xff]  ;;  %v181_v61 = vld [vmem:[#allocation6 + $0x3a8] sm:$0xff]  ;;  %v897_v63 = vpack.c.bf16 %v163_v57, %v162_v55  ;;  %v867_v0 = vpack.c.bf16 %v149_v59, %v148_v58  ;;  %v150_v6 = vld [vmem:[#allocation6 + $0x2b0] sm:$0xff] }
  0x54   :  { %854 = vmatpush3.bf16.msra.mxu1 %v853_v25  ;;  %824 = vmatprep.subr.bf16.mxu0 %v823_v26  ;;  %v132_v1 = vld [vmem:[#allocation6 + $0x220] sm:$0xff]  ;;  %v133_v2 = vld [vmem:[#allocation6 + $0x228] sm:$0xff]  ;;  %v899_v4 = vpack.c.bf16 %v181_v61, %v180_v60  ;;  %v151_v7 = vld [vmem:[#allocation6 + $0x2b8] sm:$0xff] }
  0x55   :  { %856 = vmatprep.subr.bf16.mxu1 %v855_v30  ;;  %v164_v3 = vld [vmem:[#allocation6 + $0x320] sm:$0xff]  ;;  %v165_v5 = vld [vmem:[#allocation6 + $0x328] sm:$0xff]  ;;  %v182_v8 = vld [vmem:[#allocation6 + $0x3b0] sm:$0xff]  ;;  %v869_v10 = vpack.c.bf16 %v133_v2, %v132_v1  ;;  %v871_v12 = vpack.c.bf16 %v151_v7, %v150_v6 }
  0x56   :  { %v183_v9 = vld [vmem:[#allocation6 + $0x3b8] sm:$0xff]  ;;  %v901_v11 = vpack.c.bf16 %v165_v5, %v164_v3  ;;  %v134_v13 = vld [vmem:[#allocation6 + $0x230] sm:$0xff]  ;;  %v152_v18 = vld [vmem:[#allocation6 + $0x2c0] sm:$0xff] }
  0x57   :  { %826 = vmatpush3.bf16.msra.mxu0 %v825_v36  ;;  %v135_v14 = vld [vmem:[#allocation6 + $0x238] sm:$0xff]  ;;  %v166_v15 = vld [vmem:[#allocation6 + $0x330] sm:$0xff]  ;;  %v903_v16 = vpack.c.bf16 %v183_v9, %v182_v8  ;;  %v153_v19 = vld [vmem:[#allocation6 + $0x2c8] sm:$0xff] }
  0x58   :  { %858 = vmatpush3.bf16.msra.mxu1 %v857_v37  ;;  %860 = vmatprep.subr.bf16.mxu0 %v859_v38  ;;  %v167_v17 = vld [vmem:[#allocation6 + $0x338] sm:$0xff]  ;;  %v184_v20 = vld [vmem:[#allocation6 + $0x3c0] sm:$0xff]  ;;  %v185_v21 = vld [vmem:[#allocation6 + $0x3c8] sm:$0xff]  ;;  %v873_v22 = vpack.c.bf16 %v135_v14, %v134_v13  ;;  %v875_v26 = vpack.c.bf16 %v153_v19, %v152_v18 }
  0x59   :  { %892 = vmatprep.subr.bf16.mxu1 %v891_v42  ;;  %v198_v23 = vld [vmem:[#allocation3 + $0x28] sm:$0xff]  ;;  %v200_v24 = vld [vmem:[#allocation3 + $0x38] sm:$0xff]  ;;  %v905_v25 = vpack.c.bf16 %v167_v17, %v166_v15  ;;  %v136_v27 = vld [vmem:[#allocation6 + $0x240] sm:$0xff]  ;;  %v907_v30 = vpack.c.bf16 %v185_v21, %v184_v20 }
  0x5a   :  { %266 = vmatmul.mubr.f32.vlgmr.msra.gmra.mrb[0].mxu0 %v193_v48  ;;  %v137_v28 = vld [vmem:[#allocation6 + $0x248] sm:$0xff]  ;;  %v168_v29 = vld [vmem:[#allocation6 + $0x340] sm:$0xff]  ;;  %v154_v32 = vld [vmem:[#allocation6 + $0x2d0] sm:$0xff] }
  0x5b   :  { %336 = vmatmul.mubr.f32.vlgmr.msra.gmra.mrb[0].mxu1 %v195_v49  ;;  %862 = vmatpush3.bf16.msra.mxu0 %v861_v50  ;;  %v169_v31 = vld [vmem:[#allocation6 + $0x348] sm:$0xff]  ;;  %v155_v33 = vld [vmem:[#allocation6 + $0x2d8] sm:$0xff]  ;;  %v186_v34 = vld [vmem:[#allocation6 + $0x3d0] sm:$0xff]  ;;  %v877_v36 = vpack.c.bf16 %v137_v28, %v136_v27 }
  0x5c   :  { %894 = vmatpush3.bf16.msra.mxu1 %v893_v51  ;;  %864 = vmatprep.subr.bf16.mxu0 %v863_v52  ;;  %v187_v35 = vld [vmem:[#allocation6 + $0x3d8] sm:$0xff]  ;;  %v909_v37 = vpack.c.bf16 %v169_v31, %v168_v29  ;;  %v879_v38 = vpack.c.bf16 %v155_v33, %v154_v32  ;;  %v138_v39 = vld [vmem:[#allocation6 + $0x250] sm:$0xff]  ;;  %v156_v44 = vld [vmem:[#allocation6 + $0x2e0] sm:$0xff]  ;;  %v1059_v33 = vmov 0.0  }
  0x5d   :  { %896 = vmatprep.subr.bf16.mxu1 %v895_v56  ;;  %405 = vmatprep.mubr.f32.mxu0 %v198_v23  ;;  %v139_v40 = vld [vmem:[#allocation6 + $0x258] sm:$0xff]  ;;  %v170_v41 = vld [vmem:[#allocation6 + $0x350] sm:$0xff]  ;;  %v911_v42 = vpack.c.bf16 %v187_v35, %v186_v34  ;;  %v157_v45 = vld [vmem:[#allocation6 + $0x2e8] sm:$0xff] }
  0x5e   :  { %475 = vmatprep.mubr.f32.mxu1 %v200_v24  ;;  %v171_v43 = vld [vmem:[#allocation6 + $0x358] sm:$0xff]  ;;  %v188_v46 = vld [vmem:[#allocation6 + $0x3e0] sm:$0xff]  ;;  %v189_v47 = vld [vmem:[#allocation6 + $0x3e8] sm:$0xff]  ;;  %v881_v48 = vpack.c.bf16 %v139_v40, %v138_v39  ;;  %v883_v50 = vpack.c.bf16 %v157_v45, %v156_v44 }
  0x5f   :  { %866 = vmatpush3.bf16.msra.mxu0 %v865_v62  ;;  %v913_v49 = vpack.c.bf16 %v171_v43, %v170_v41  ;;  %v140_v51 = vld [vmem:[#allocation6 + $0x260] sm:$0xff]  ;;  %v141_v52 = vld [vmem:[#allocation6 + $0x268] sm:$0xff]  ;;  %v915_v54 = vpack.c.bf16 %v189_v47, %v188_v46  ;;  %v158_v56 = vld [vmem:[#allocation6 + $0x2f0] sm:$0xff] }
  0x60   :  { %898 = vmatpush3.bf16.msra.mxu1 %v897_v63  ;;  %868 = vmatprep.subr.bf16.mxu0 %v867_v0  ;;  %v172_v53 = vld [vmem:[#allocation6 + $0x360] sm:$0xff]  ;;  %v173_v55 = vld [vmem:[#allocation6 + $0x368] sm:$0xff]  ;;  %v159_v57 = vld [vmem:[#allocation6 + $0x2f8] sm:$0xff]  ;;  %v885_v60 = vpack.c.bf16 %v141_v52, %v140_v51 }
  0x61   :  { %900 = vmatprep.subr.bf16.mxu1 %v899_v4  ;;  %v190_v58 = vld [vmem:[#allocation6 + $0x3f0] sm:$0xff]  ;;  %v191_v59 = vld [vmem:[#allocation6 + $0x3f8] sm:$0xff]  ;;  %v917_v61 = vpack.c.bf16 %v173_v55, %v172_v53  ;;  %v887_v62 = vpack.c.bf16 %v159_v57, %v158_v56  ;;  %v197_v6 = vld [vmem:[#allocation3 + $0x20] sm:$0xff] }
  0x62   :  { %v142_v63 = vld [vmem:[#allocation6 + $0x270] sm:$0xff]  ;;  %v143_v0 = vld [vmem:[#allocation6 + $0x278] sm:$0xff]  ;;  %v919_v1 = vpack.c.bf16 %v191_v59, %v190_v58  ;;  %v496_v8 = vld [vmem:[#allocation8] sm:$0xff] }
  0x63   :  { %870 = vmatpush3.bf16.msra.mxu0 %v869_v10  ;;  %v174_v2 = vld [vmem:[#allocation6 + $0x370] sm:$0xff]  ;;  %v175_v3 = vld [vmem:[#allocation6 + $0x378] sm:$0xff]  ;;  %v889_v4 = vpack.c.bf16 %v143_v0, %v142_v63  ;;  %v497_v9 = vld [vmem:[#allocation8 + $0x8] sm:$0xff] }
  0x64   :  { %902 = vmatpush3.bf16.msra.mxu1 %v901_v11  ;;  %872 = vmatprep.subr.bf16.mxu0 %v871_v12  ;;  %v921_v5 = vpack.c.bf16 %v175_v3, %v174_v2  ;;  %v199_v7 = vld [vmem:[#allocation3 + $0x30] sm:$0xff]  ;;  %v1057_v11 = vmov 0.0|0.0   ;;  %v924_v12 = vpack.c.bf16 %v497_v9, %v496_v8  ;;  %v499_v13 = vld [vmem:[#allocation8 + $0x18] sm:$0xff]  ;;  %v500_v15 = vld [vmem:[#allocation8 + $0x20] sm:$0xff] }
  0x65   :  { %904 = vmatprep.subr.bf16.mxu1 %v903_v16  ;;  %v498_v10 = vld [vmem:[#allocation8 + $0x10] sm:$0xff]  ;;  %v501_v16 = vld [vmem:[#allocation8 + $0x28] sm:$0xff]  ;;  %v503_v19 = vld [vmem:[#allocation8 + $0x38] sm:$0xff] }
  0x66   :  { %v927_v14 = vpack.c.bf16 %v499_v13, %v498_v10  ;;  %v930_v17 = vpack.c.bf16 %v501_v16, %v500_v15  ;;  %v502_v18 = vld [vmem:[#allocation8 + $0x30] sm:$0xff]  ;;  %v504_v21 = vld [vmem:[#allocation8 + $0x40] sm:$0xff]  ;;  %v509_v28 = vld [vmem:[#allocation8 + $0x68] sm:$0xff] }
  0x67   :  { %874 = vmatpush3.bf16.msra.mxu0 %v873_v22  ;;  %v933_v20 = vpack.c.bf16 %v503_v19, %v502_v18  ;;  %v505_v22 = vld [vmem:[#allocation8 + $0x48] sm:$0xff]  ;;  %v506_v24 = vld [vmem:[#allocation8 + $0x50] sm:$0xff]  ;;  %v508_v27 = vld [vmem:[#allocation8 + $0x60] sm:$0xff] }
  0x68   :  { %906 = vmatpush3.bf16.msra.mxu1 %v905_v25  ;;  %876 = vmatprep.subr.bf16.mxu0 %v875_v26  ;;  %v936_v23 = vpack.c.bf16 %v505_v22, %v504_v21  ;;  %v507_v25 = vld [vmem:[#allocation8 + $0x58] sm:$0xff]  ;;  %v942_v29 = vpack.c.bf16 %v509_v28, %v508_v27 }
  0x69   :  { %908 = vmatprep.subr.bf16.mxu1 %v907_v30  ;;  %v939_v26 = vpack.c.bf16 %v507_v25, %v506_v24  ;;  %v510_v30 = vld [vmem:[#allocation8 + $0x70] sm:$0xff]  ;;  %v511_v31 = vld [vmem:[#allocation8 + $0x78] sm:$0xff] }
  0x6a   :  { %v945_v32 = vpack.c.bf16 %v511_v31, %v510_v30 }
  0x6b   :  { %878 = vmatpush3.bf16.msra.mxu0 %v877_v36 }
  0x6c   :  { %910 = vmatpush3.bf16.msra.mxu1 %v909_v37  ;;  %880 = vmatprep.subr.bf16.mxu0 %v879_v38 }
  0x6d   :  { %912 = vmatprep.subr.bf16.mxu1 %v911_v42 }
  0x6f   :  { %882 = vmatpush3.bf16.msra.mxu0 %v881_v48  ;;  %v602_v48 = vld [vmem:[%s1145_s2] ss:$0 sm:$0xff] }
  0x70   :  { %914 = vmatpush3.bf16.msra.mxu1 %v913_v49  ;;  %884 = vmatprep.subr.bf16.mxu0 %v883_v50 }
  0x71   :  { %916 = vmatprep.subr.bf16.mxu1 %v915_v54 }
  0x73   :  { %886 = vmatpush3.bf16.msra.mxu0 %v885_v60 }
  0x74   :  { %918 = vmatpush3.bf16.msra.mxu1 %v917_v61  ;;  %888 = vmatprep.subr.bf16.mxu0 %v887_v62 }
  0x75   :  { %920 = vmatprep.subr.bf16.mxu1 %v919_v1 }
  0x77   :  { %890 = vmatpush3.bf16.msra.mxu0 %v889_v4 }
  0x78   :  { %922 = vmatpush3.bf16.msra.mxu1 %v921_v5  ;;  %923 = vmatprep.subr.bf16.mxu0 %v1057_v11 }
  0x7a   :  { %406 = vmatmul.mubr.f32.vlgmr.msra.gmra.mrb[2].mxu0 %v197_v6 }
  0x7b   :  { %476 = vmatmul.mubr.f32.vlgmr.msra.gmra.mrb[2].mxu1 %v199_v7  ;;  %925 = vmatpush3.bf16.msra.mxu0 %v924_v12 }
  0x7c   :  { %926 = vmatprep.subr.bf16.mxu0 %v1057_v11  ;;  %792 = vmatprep.mubr.msk.f32.mxu0 %vm1058_vm0, %v1059_v33 }
  0x7f   :  { %928 = vmatpush3.bf16.msra.mxu0 %v927_v14 }
  0x80   :  { %929 = vmatprep.subr.bf16.mxu0 %v1057_v11 }
  0x83   :  { %931 = vmatpush3.bf16.msra.mxu0 %v930_v17 }
  0x84   :  { %932 = vmatprep.subr.bf16.mxu0 %v1057_v11 }
  0x87   :  { %934 = vmatpush3.bf16.msra.mxu0 %v933_v20 }
  0x88   :  { %935 = vmatprep.subr.bf16.mxu0 %v1057_v11 }
  0x8b   :  { %937 = vmatpush3.bf16.msra.mxu0 %v936_v23 }
  0x8c   :  { %938 = vmatprep.subr.bf16.mxu0 %v1057_v11 }
  0x8f   :  { %940 = vmatpush3.bf16.msra.mxu0 %v939_v26 }
  0x90   :  { %941 = vmatprep.subr.bf16.mxu0 %v1057_v11 }
  0x93   :  { %943 = vmatpush3.bf16.msra.mxu0 %v942_v29 }
  0x94   :  { %944 = vmatprep.subr.bf16.mxu0 %v1057_v11 }
  0x97   :  { %946 = vmatpush3.bf16.msra.mxu0 %v945_v32 }
 0x12d   :  { %v635_v34 = vpop.f32.mrb[0].mxu0 }
 0x12e   :  { %v670_v35 = vpop.f32.mrb[0].mxu1  ;;  %v636_v36 = vpop.f32.mrb[1].mxu0 }
 0x12f   :  { %v637_v37 = vadd.f32 %v636_v36, %v635_v34  ;;  %v671_v38 = vpop.f32.mrb[1].mxu1 }
 0x130   :  { %v672_v39 = vadd.f32 %v671_v38, %v670_v35 }
 0x132   :  { %v338_v40 = vadd.f32 %v672_v39, %v637_v37 }
 0x14d   :  { %v705_v41 = vpop.f32.mrb[2].mxu0 }
 0x14e   :  { %v706_v42 = vpop.f32.mrb[3].mxu0  ;;  %v740_v43 = vpop.f32.mrb[2].mxu1 }
 0x14f   :  { %v707_v44 = vadd.f32 %v706_v42, %v705_v41  ;;  %v741_v45 = vpop.f32.mrb[3].mxu1 }
 0x150   :  { %v742_v46 = vadd.f32 %v741_v45, %v740_v43 }
 0x151   :  { %v408_v47 = vadd.f32 %v707_v44, %v338_v40 }
 0x153   :  { %v478_v49 = vadd.f32 %v742_v46, %v408_v47 }
 0x155   :  { %v494_v50 = vsub.f32 %v478_v49, %v602_v48 }
 0x157   :  { %v495_v51 = vmul.f32 %v494_v50, %v494_v50 }
 0x159   :  { %793 = vmatmul.mubr.f32.vlgmr.msra.gmra.mrb[4].mxu0 %v495_v51 }
 0x22c   :  { %v578_v52 = vpop.f32.mrb[4].mxu0 }
 0x22d   :  { %v582_v53 = vsub.f32 0.0, %v578_v52  ;;  %v794_v54 = vpop.f32.mrb[5].mxu0 }
 0x22f   :  { %v583_v55 = vmul.f32 1.442695, %v582_v53 }
 0x231   :  { %956 = vpow2.f32 %v583_v55 }
 0x23b   :  { %v957_v56 = vpop.eup %956 }
 0x23c   :  { %585 = vst [vmem:[#allocation9] sm:$0xff] %v957_v56 }
 0x23d   :  { %1035 = shalt.err (!%p1032_p0)
}
 0x23e   :  { %s1036_s30 = scalar_lea.hbm %s1147_s4, 128 }
 0x23f   :  { %p1037_p1 = scmp.ne.s32.totalorder %s1147_s4, %s1036_s30  ;;  %p1040_p2 = scmp.lt.u32.totalorder %s1036_s30, %s1147_s4 }
 0x241   :  { %p1042_p3 = pnand %p1040_p2, %p1037_p1 }
 0x243   :  { %1045 = shalt.err (!%p1042_p3)
}
 0x244   :  { %595 = dma.vmem_to_hbm [thread:$0]  %s593_s27, 128, %s1147_s4, [#allocation5]  }
 0x245   :  { %1050 = dma.done.wait [#allocation5], 128  }
 0x246   :  { %1051 = vsyncadd [#allocation5], 4294967168 }
 0x247   :  { %599 = vsyncpa [#allocation4], 1 }
 0x248   :  { %600 = vsyncpa [#allocation7], 1 }
 0x249   :  { %601 = vsyncpa [#allocation5], 1 }

</bundles_post_ra>
